<compile_context>
chip_gen: v7x
topology: tpu7x:2x2x1
jax: 0.10.0
libtpu: 0.0.40
codegen_flags: <defaults>
</compile_context>

<pallas_src>
import jax
import jax.numpy as jnp
from jax.experimental import pallas as pl
from jax.experimental.pallas import tpu as pltpu

C_TOTAL = 256       # split(..., 128, dim=1) in forward implies exactly 2 x 128 channels
C_HALF = 128
MAX_HW_TILE = 1024  # lane columns per block along the spatial axis
LANE_BUDGET = 1024  # target n_tile * hw_tile (columns of 256 f32 rows ~= 1 MiB/operand)


def _round_up(v, m):
    return (v + m - 1) // m * m


def _softmax_mix_kernel(feat_ref, x_ref, o_ref):
    # feat_ref / x_ref / o_ref: (NT, 256, T) VMEM tiles.
    # Channels on sublanes, spatial on lanes -> channel reduction is a cheap
    # cross-vreg max/add tree; the 128-channel split is plain sublane slicing.
    f = feat_ref[...].astype(jnp.float32)                # (NT, 256, T)
    m = jnp.max(f, axis=1, keepdims=True)                # (NT, 1, T)  stable softmax
    e = jnp.exp(f - m)                                   # (NT, 256, T)
    s = jnp.sum(e, axis=1, keepdims=True)                # (NT, 1, T)
    r = pl.reciprocal(s, approx=True)                    # EUP slot (free)
    inv = r * (2.0 - s * r)                              # one Newton step -> f32 accuracy

    x = x_ref[...].astype(jnp.float32)                   # (NT, 256, T)
    x0 = x[:, :C_HALF, :]
    x1 = x[:, C_HALF:, :]
    p0 = e[:, :C_HALF, :] * inv
    p1 = e[:, C_HALF:, :] * inv

    # x0*p0 + x1*(1-p0) == x1 + (x0-x1)*p0  (fewer VPU ops), same for the other half.
    o_ref[:, :C_HALF, :] = (x1 + (x0 - x1) * p0).astype(o_ref.dtype)
    o_ref[:, C_HALF:, :] = (x0 + (x1 - x0) * p1).astype(o_ref.dtype)


def softmax_layer(feature, x):
    """feature, x: (N, 256, H, W) arrays (NCHW, like PyTorch). Returns (N, 256, H, W)."""
    assert feature.shape == x.shape
    n, c, h, w = feature.shape
    assert c == C_TOTAL, f"expected {C_TOTAL} channels, got {c}"

    hw = h * w
    # Contiguous reshape only -- no transposes, no padding, channels stay on dim 1.
    feat3 = feature.reshape(n, c, hw)
    x3 = x.reshape(n, c, hw)

    # Lane-aligned spatial tile (multiple of 128), capped at MAX_HW_TILE.
    hw_tile = min(MAX_HW_TILE, _round_up(hw, 128))
    # Pack several batch elements per block when the spatial map is small.
    n_tile = max(1, min(n, LANE_BUDGET // hw_tile))
    # Keep >= 2 grid steps whenever possible so v7x's two TensorCores both engage.
    if n > 1 and pl.cdiv(n, n_tile) * pl.cdiv(hw, hw_tile) < 2:
        n_tile = pl.cdiv(n, 2)

    grid = (pl.cdiv(n, n_tile), pl.cdiv(hw, hw_tile))
    spec = pl.BlockSpec((n_tile, C_TOTAL, hw_tile), lambda b, j: (b, 0, j))

    out3 = pl.pallas_call(
        _softmax_mix_kernel,
        out_shape=jax.ShapeDtypeStruct((n, c, hw), x.dtype),
        grid_spec=pltpu.PrefetchScalarGridSpec(
            num_scalar_prefetch=0,
            grid=grid,
            in_specs=[spec, spec],
            out_specs=spec,
        ),
        compiler_params=pltpu.CompilerParams(
            dimension_semantics=("parallel", "parallel")),
    )(feat3, x3)

    return out3.reshape(n, c, h, w)


def _reference(feature, x):
    p = jax.nn.softmax(feature.astype(jnp.float32), axis=1)
    p0, p1 = p[:, :C_HALF], p[:, C_HALF:]
    x0 = x[:, :C_HALF].astype(jnp.float32)
    x1 = x[:, C_HALF:].astype(jnp.float32)
    x0_t = x0 * p0 + x1 * (1.0 - p0)
    x1_t = x1 * p1 + x0 * (1.0 - p1)
    return jnp.concatenate([x0_t, x1_t], axis=1).astype(x.dtype)


if __name__ == "__main__":
    key = jax.random.PRNGKey(0)
    keys = jax.random.split(key, 8)

    # Case 1: tiny ragged spatial map (H*W = 25 -> one masked 128-lane tile,
    # batch elements packed per block), like SoftmaxLayer sees inside modelXJH.
    n, h, w = 2, 5, 5
    feature = jax.random.normal(keys[0], (n, C_TOTAL, h, w), dtype=jnp.float32)
    x = jax.random.normal(keys[1], (n, C_TOTAL, h, w), dtype=jnp.float32)
    out = jax.block_until_ready(softmax_layer(feature, x))
    ref = jax.block_until_ready(_reference(feature, x))
    assert out.shape == (n, C_TOTAL, h, w)
    assert jnp.allclose(out, ref, atol=1e-5, rtol=1e-5), "mismatch vs reference (case 1)"

    # Case 2: lane-aligned spatial size (H*W = 256, no masking; batch axis split
    # into 2 grid steps).
    n2, h2, w2 = 2, 16, 16
    feature2 = jax.random.normal(keys[2], (n2, C_TOTAL, h2, w2), dtype=jnp.float32)
    x2 = jax.random.normal(keys[3], (n2, C_TOTAL, h2, w2), dtype=jnp.float32)
    out2 = jax.block_until_ready(softmax_layer(feature2, x2))
    ref2 = jax.block_until_ready(_reference(feature2, x2))
    assert out2.shape == (n2, C_TOTAL, h2, w2)
    assert jnp.allclose(out2, ref2, atol=1e-5, rtol=1e-5), "mismatch vs reference (case 2)"

    # Case 3: larger spatial map spanning multiple hw tiles with a ragged tail
    # (H*W = 1600 -> tiles of 1024 + masked 576).
    n3, h3, w3 = 1, 40, 40
    feature3 = jax.random.normal(keys[4], (n3, C_TOTAL, h3, w3), dtype=jnp.float32)
    x3 = jax.random.normal(keys[5], (n3, C_TOTAL, h3, w3), dtype=jnp.float32)
    out3 = jax.block_until_ready(softmax_layer(feature3, x3))
    ref3 = jax.block_until_ready(_reference(feature3, x3))
    assert jnp.allclose(out3, ref3, atol=1e-5, rtol=1e-5), "mismatch vs reference (case 3)"

    # Case 4: bf16 I/O (f32 compute inside the kernel).
    n4, h4, w4 = 2, 9, 13
    feature4 = jax.random.normal(keys[6], (n4, C_TOTAL, h4, w4), dtype=jnp.bfloat16)
    x4 = jax.random.normal(keys[7], (n4, C_TOTAL, h4, w4), dtype=jnp.bfloat16)
    out4 = jax.block_until_ready(softmax_layer(feature4, x4))
    ref4 = jax.block_until_ready(_reference(feature4, x4))
    assert out4.dtype == jnp.bfloat16
    assert jnp.allclose(out4.astype(jnp.float32), ref4.astype(jnp.float32),
                        atol=2e-2, rtol=2e-2), "mismatch vs reference (case 4)"

    print("KERNEL_OK")
</pallas_src>

<mosaic_0001>
module attributes {stable_mosaic.version = 11 : i64} {
  func.func @_softmax_mix_kernel(%arg0: i32, %arg1: i32, %arg2: memref<1x256x128xf32, #tpu.memory_space<vmem>>, %arg3: memref<1x256x128xf32, #tpu.memory_space<vmem>>, %arg4: memref<1x256x128xf32, #tpu.memory_space<vmem>>) attributes {dimension_semantics = [#tpu.dimension_semantics<parallel>, #tpu.dimension_semantics<parallel>], iteration_bounds = array<i64: 2, 1>, scalar_prefetch = 0 : i64, scratch_operands = 0 : i64, tpu.core_type = #tpu.core_type<tc>, window_params = [{transform_indices = @transform_0, window_bounds = array<i64: 1, 256, 128>}, {transform_indices = @transform_1, window_bounds = array<i64: 1, 256, 128>}, {transform_indices = @transform_2, window_bounds = array<i64: 1, 256, 128>}]} {
    %c0 = arith.constant 0 : index
    %c0_0 = arith.constant 0 : index
    %c0_1 = arith.constant 0 : index
    %0 = vector.load %arg2[%c0, %c0_0, %c0_1] : memref<1x256x128xf32, #tpu.memory_space<vmem>>, vector<1x256x128xf32>
    %cst = arith.constant dense<0xFF800000> : vector<1x128xf32>
    %1 = vector.multi_reduction <maximumf>, %0, %cst [1] : vector<1x256x128xf32> to vector<1x128xf32>
    %2 = vector.shape_cast %1 : vector<1x128xf32> to vector<1x1x128xf32>
    %3 = vector.broadcast %2 : vector<1x1x128xf32> to vector<1x256x128xf32>
    %4 = arith.subf %0, %3 : vector<1x256x128xf32>
    %5 = math.exp %4 : vector<1x256x128xf32>
    %cst_2 = arith.constant dense<0.000000e+00> : vector<1x128xf32>
    %6 = vector.multi_reduction <add>, %5, %cst_2 [1] : vector<1x256x128xf32> to vector<1x128xf32>
    %7 = vector.shape_cast %6 : vector<1x128xf32> to vector<1x1x128xf32>
    %8 = tpu.reciprocal %7 {approx = true} : vector<1x1x128xf32> -> vector<1x1x128xf32>
    %9 = arith.mulf %7, %8 : vector<1x1x128xf32>
    %cst_3 = arith.constant 2.000000e+00 : f32
    %10 = vector.broadcast %cst_3 : f32 to vector<1x1x128xf32>
    %11 = arith.subf %10, %9 : vector<1x1x128xf32>
    %12 = arith.mulf %8, %11 : vector<1x1x128xf32>
    %c0_4 = arith.constant 0 : index
    %c0_5 = arith.constant 0 : index
    %c0_6 = arith.constant 0 : index
    %13 = vector.load %arg3[%c0_4, %c0_5, %c0_6] : memref<1x256x128xf32, #tpu.memory_space<vmem>>, vector<1x256x128xf32>
    %14 = vector.extract_strided_slice %13 {offsets = [0, 0, 0], sizes = [1, 128, 128], strides = [1, 1, 1]} : vector<1x256x128xf32> to vector<1x128x128xf32>
    %15 = vector.extract_strided_slice %13 {offsets = [0, 128, 0], sizes = [1, 128, 128], strides = [1, 1, 1]} : vector<1x256x128xf32> to vector<1x128x128xf32>
    %16 = vector.extract_strided_slice %5 {offsets = [0, 0, 0], sizes = [1, 128, 128], strides = [1, 1, 1]} : vector<1x256x128xf32> to vector<1x128x128xf32>
    %17 = vector.broadcast %12 : vector<1x1x128xf32> to vector<1x128x128xf32>
    %18 = arith.mulf %16, %17 : vector<1x128x128xf32>
    %19 = vector.extract_strided_slice %5 {offsets = [0, 128, 0], sizes = [1, 128, 128], strides = [1, 1, 1]} : vector<1x256x128xf32> to vector<1x128x128xf32>
    %20 = vector.broadcast %12 : vector<1x1x128xf32> to vector<1x128x128xf32>
    %21 = arith.mulf %19, %20 : vector<1x128x128xf32>
    %22 = arith.subf %14, %15 : vector<1x128x128xf32>
    %23 = arith.mulf %22, %18 : vector<1x128x128xf32>
    %24 = arith.addf %15, %23 : vector<1x128x128xf32>
    %c0_7 = arith.constant 0 : index
    %c0_8 = arith.constant 0 : index
    %c0_9 = arith.constant 0 : index
    %25 = vector.load %arg4[%c0_7, %c0_8, %c0_9] : memref<1x256x128xf32, #tpu.memory_space<vmem>>, vector<1x128x128xf32>
    tpu.vector_store %arg4[%c0_7, %c0_8, %c0_9], %24 {strides = array<i32>} : memref<1x256x128xf32, #tpu.memory_space<vmem>>, vector<1x128x128xf32>,
    %26 = arith.subf %15, %14 : vector<1x128x128xf32>
    %27 = arith.mulf %26, %21 : vector<1x128x128xf32>
    %28 = arith.addf %14, %27 : vector<1x128x128xf32>
    %c0_10 = arith.constant 0 : index
    %c128 = arith.constant 128 : index
    %c0_11 = arith.constant 0 : index
    %29 = vector.load %arg4[%c0_10, %c128, %c0_11] : memref<1x256x128xf32, #tpu.memory_space<vmem>>, vector<1x128x128xf32>
    tpu.vector_store %arg4[%c0_10, %c128, %c0_11], %28 {strides = array<i32>} : memref<1x256x128xf32, #tpu.memory_space<vmem>>, vector<1x128x128xf32>,
    return
  }
  func.func @transform_0(%arg0: i32, %arg1: i32) -> (i32, i32, i32) {
    %c0_i32 = arith.constant 0 : i32
    %c0_i32_0 = arith.constant 0 : i32
    return %arg0, %c0_i32, %arg1 : i32, i32, i32
  }
  func.func @transform_1(%arg0: i32, %arg1: i32) -> (i32, i32, i32) {
    %c0_i32 = arith.constant 0 : i32
    %c0_i32_0 = arith.constant 0 : i32
    return %arg0, %c0_i32, %arg1 : i32, i32, i32
  }
  func.func @transform_2(%arg0: i32, %arg1: i32) -> (i32, i32, i32) {
    %c0_i32 = arith.constant 0 : i32
    %c0_i32_0 = arith.constant 0 : i32
    return %arg0, %c0_i32, %arg1 : i32, i32, i32
  }
}

</mosaic_0001>

<bundles_post_ra>
// kernel: tpu_custom_call.1
= control target key start
LH: loop header
LB: loop body
LE: loop exit
PB: predicated region body
PF: predicated region fallthrough
CT: control target
= control target key end

     0   :  { %s850_s9 = smov 0   ;;  %s852_s10 = smov 0   ;;  %s1549_s0 = inlined_call_operand.vmem [shape: f32[2,256,25], index: 0, kind: input, shape index: {}]   ;;  %s1550_s1 = inlined_call_operand.vmem [shape: f32[2,256,25], index: 1, kind: input, shape index: {}]   ;;  %s1551_s2 = inlined_call_operand.vmem [shape: f32[2,256,25], index: 2, kind: output, shape index: {}]  }
   0x1   :  { %s854_s11 = smov 0  }
   0x2 LB: > { %s24_s12 = sadd.s32 1, %s829_s10  ;;  %p709_p0 = scmp.ge.s32.totalorder %s833_s11, 1  ;;  %s833_s11 = sphi %s854_s11, %s12_s11   ;;  %s829_s10 = sphi %s852_s10, %s1635_s10   ;;  %s825_s9 = sphi %s850_s9, %s1634_s9  }
   0x3   : > { %p26_p1 = scmp.ge.s32.totalorder %s24_s12, 2  ;;  %p146_p2 = scmp.lt.s32.totalorder %s833_s11, 3 }
   0x5   : > { %s1637_s12 = smov (%p26_p1, %s24_s12), 0  ;;  %p147_p3 = pnand %p709_p0, %p146_p2 }
   0x7   : > { %150 = sbr.rel (%p147_p3) target bundleno = 195 (0xc3), region = 28 }
   0xe   : > { %p182_p4 = scmp.lt.s32.totalorder %s825_s9, 1 }
  0x10   : > { %s1639_s9 = smov (!%p182_p4, %s825_s9), 1 }
  0x11   : > { %s868_s13 = sshll.u32 %s1639_s9, 8 }
  0x12   : > { %s874_s16 = scalar_lea.vmem %s1549_s0, %s868_s13  ;;  %s1170_s19 = scalar_lea.vmem %s1550_s1, %s868_s13 }
  0x13   : > { %v877_v0 = vld [vmem:[%s874_s16] sm:$0xff]  ;;  %v880_v1 = vld [vmem:[%s874_s16 + $0x8] sm:$0xff]  ;;  %v883_v2 = vld [vmem:[%s874_s16 + $0x10] sm:$0xff]  ;;  %s1354_s22 = scalar_lea.vmem %s1551_s2, %s868_s13 }
  0x14   : > { %v886_v3 = vld [vmem:[%s874_s16 + $0x18] sm:$0xff]  ;;  %v889_v4 = vld [vmem:[%s874_s16 + $0x20] sm:$0xff]  ;;  %v892_v5 = vld [vmem:[%s874_s16 + $0x28] sm:$0xff] }
  0x15   : > { %v895_v6 = vld [vmem:[%s874_s16 + $0x30] sm:$0xff]  ;;  %v898_v7 = vld [vmem:[%s874_s16 + $0x38] sm:$0xff]  ;;  %v901_v8 = vld [vmem:[%s874_s16 + $0x40] sm:$0xff]  ;;  %v238_v9 = vmax.f32 %v877_v0, %v889_v4  ;;  %v239_v10 = vmax.f32 %v880_v1, %v892_v5 }
  0x16   : > { %v908_v11 = vld [vmem:[%s874_s16 + $0x48] sm:$0xff]  ;;  %v911_v12 = vld [vmem:[%s874_s16 + $0x50] sm:$0xff]  ;;  %v914_v13 = vld [vmem:[%s874_s16 + $0x58] sm:$0xff]  ;;  %v240_v14 = vmax.f32 %v883_v2, %v895_v6  ;;  %v241_v15 = vmax.f32 %v886_v3, %v898_v7 }
  0x17   : > { %v921_v16 = vld [vmem:[%s874_s16 + $0x60] sm:$0xff]  ;;  %v924_v17 = vld [vmem:[%s874_s16 + $0x68] sm:$0xff]  ;;  %v927_v18 = vld [vmem:[%s874_s16 + $0x70] sm:$0xff]  ;;  %v242_v19 = vmax.f32 %v238_v9, %v901_v8  ;;  %v243_v20 = vmax.f32 %v239_v10, %v908_v11 }
  0x18   : > { %v932_v21 = vld [vmem:[%s874_s16 + $0x78] sm:$0xff]  ;;  %v935_v22 = vld [vmem:[%s874_s16 + $0x80] sm:$0xff]  ;;  %v938_v23 = vld [vmem:[%s874_s16 + $0x88] sm:$0xff]  ;;  %v244_v24 = vmax.f32 %v240_v14, %v911_v12  ;;  %v245_v25 = vmax.f32 %v241_v15, %v914_v13 }
  0x19   : > { %v943_v26 = vld [vmem:[%s874_s16 + $0x90] sm:$0xff]  ;;  %v946_v27 = vld [vmem:[%s874_s16 + $0x98] sm:$0xff]  ;;  %v246_v28 = vmax.f32 %v242_v19, %v921_v16  ;;  %v247_v29 = vmax.f32 %v243_v20, %v924_v17  ;;  %v951_v30 = vld [vmem:[%s874_s16 + $0xa0] sm:$0xff] }
  0x1a   : > { %v954_v31 = vld [vmem:[%s874_s16 + $0xa8] sm:$0xff]  ;;  %v248_v32 = vmax.f32 %v244_v24, %v927_v18  ;;  %v249_v33 = vmax.f32 %v245_v25, %v932_v21  ;;  %v959_v34 = vld [vmem:[%s874_s16 + $0xb0] sm:$0xff]  ;;  %v962_v35 = vld [vmem:[%s874_s16 + $0xb8] sm:$0xff] }
  0x1b   : > { %v250_v36 = vmax.f32 %v246_v28, %v935_v22  ;;  %v251_v37 = vmax.f32 %v247_v29, %v938_v23  ;;  %v967_v38 = vld [vmem:[%s874_s16 + $0xc0] sm:$0xff]  ;;  %v970_v39 = vld [vmem:[%s874_s16 + $0xc8] sm:$0xff]  ;;  %v975_v42 = vld [vmem:[%s874_s16 + $0xd0] sm:$0xff] }
  0x1c   : > { %v252_v40 = vmax.f32 %v248_v32, %v943_v26  ;;  %v253_v41 = vmax.f32 %v249_v33, %v946_v27  ;;  %v978_v43 = vld [vmem:[%s874_s16 + $0xd8] sm:$0xff]  ;;  %v983_v46 = vld [vmem:[%s874_s16 + $0xe0] sm:$0xff]  ;;  %v986_v47 = vld [vmem:[%s874_s16 + $0xe8] sm:$0xff] }
  0x1d   : > { %v254_v44 = vmax.f32 %v250_v36, %v951_v30  ;;  %v255_v45 = vmax.f32 %v251_v37, %v954_v31  ;;  %v991_v50 = vld [vmem:[%s874_s16 + $0xf0] sm:$0xff]  ;;  %v994_v51 = vld [vmem:[%s874_s16 + $0xf8] sm:$0xff] }
  0x1e   : > { %v256_v48 = vmax.f32 %v252_v40, %v959_v34  ;;  %v257_v49 = vmax.f32 %v253_v41, %v962_v35 }
  0x1f   : > { %v258_v52 = vmax.f32 %v254_v44, %v967_v38  ;;  %v259_v53 = vmax.f32 %v255_v45, %v970_v39 }
  0x20   : > { %v260_v54 = vmax.f32 %v256_v48, %v975_v42  ;;  %v261_v55 = vmax.f32 %v257_v49, %v978_v43 }
  0x21   : > { %v262_v56 = vmax.f32 %v258_v52, %v983_v46  ;;  %v263_v57 = vmax.f32 %v259_v53, %v986_v47 }
  0x22   : > { %v264_v58 = vmax.f32 %v260_v54, %v991_v50  ;;  %v265_v59 = vmax.f32 %v261_v55, %v994_v51 }
  0x23   : > { %v266_v60 = vmax.f32 %v262_v56, %v263_v57 }
  0x24   : > { %v267_v61 = vmax.f32 %v264_v58, %v265_v59 }
  0x26   : > { %v268_v62 = vmax.f32 %v266_v60, %v267_v61 }
  0x28   : > { %v269_v63 = vrot.slane %v268_v62, 4 }
  0x2a   : > { %v270_v9 = vmax.f32 %v268_v62, %v269_v63 }
  0x2c   : > { %v271_v10 = vrot.slane %v270_v9, 2 }
  0x2e   : > { %v272_v14 = vmax.f32 %v270_v9, %v271_v10 }
  0x30   : > { %v273_v15 = vrot.slane %v272_v14, 1 }
  0x32   : > { %v1004_v19 = vmax.f32 %v272_v14, %v273_v15 }
  0x34   : > { %v275_v20 = vsub.f32 %v877_v0, %v1004_v19  ;;  %v276_v24 = vsub.f32 %v880_v1, %v1004_v19  ;;  %v277_v25 = vsub.f32 %v883_v2, %v1004_v19  ;;  %v278_v28 = vsub.f32 %v886_v3, %v1004_v19 }
  0x35   : > { %v279_v29 = vsub.f32 %v889_v4, %v1004_v19  ;;  %v280_v37 = vsub.f32 %v892_v5, %v1004_v19  ;;  %v281_v0 = vsub.f32 %v895_v6, %v1004_v19  ;;  %v282_v2 = vsub.f32 %v898_v7, %v1004_v19 }
  0x36   : > { %v307_v32 = vmul.f32 1.442695, %v275_v20  ;;  %v309_v33 = vmul.f32 1.442695, %v276_v24  ;;  %v311_v36 = vmul.f32 1.442695, %v277_v25  ;;  %v283_v4 = vsub.f32 %v901_v8, %v1004_v19 }
  0x37   : > { %v313_v40 = vmul.f32 1.442695, %v278_v28  ;;  %v315_v1 = vmul.f32 1.442695, %v279_v29  ;;  %v317_v3 = vmul.f32 1.442695, %v280_v37  ;;  %v284_v5 = vsub.f32 %v908_v11, %v1004_v19 }
  0x38   : > { %745 = vpow2.f32 %v307_v32  ;;  %v319_v41 = vmul.f32 1.442695, %v281_v0  ;;  %v321_v44 = vmul.f32 1.442695, %v282_v2  ;;  %v285_v6 = vsub.f32 %v911_v12, %v1004_v19 }
  0x39   : > { %747 = vpow2.f32 %v309_v33  ;;  %v323_v45 = vmul.f32 1.442695, %v283_v4  ;;  %v286_v49 = vsub.f32 %v914_v13, %v1004_v19  ;;  %v325_v8 = vmul.f32 1.442695, %v284_v5 }
  0x3a   : > { %749 = vpow2.f32 %v311_v36  ;;  %v287_v12 = vsub.f32 %v921_v16, %v1004_v19  ;;  %v327_v54 = vmul.f32 1.442695, %v285_v6  ;;  %v288_v13 = vsub.f32 %v924_v17, %v1004_v19 }
  0x3b   : > { %751 = vpow2.f32 %v313_v40  ;;  %v329_v57 = vmul.f32 1.442695, %v286_v49  ;;  %v289_v60 = vsub.f32 %v927_v18, %v1004_v19  ;;  %v290_v63 = vsub.f32 %v932_v21, %v1004_v19 }
  0x3c   : > { %753 = vpow2.f32 %v315_v1  ;;  %v331_v16 = vmul.f32 1.442695, %v287_v12  ;;  %v333_v17 = vmul.f32 1.442695, %v288_v13  ;;  %v291_v14 = vsub.f32 %v935_v22, %v1004_v19 }
  0x3d   : > { %755 = vpow2.f32 %v317_v3  ;;  %v335_v18 = vmul.f32 1.442695, %v289_v60  ;;  %v292_v24 = vsub.f32 %v938_v23, %v1004_v19  ;;  %v337_v21 = vmul.f32 1.442695, %v290_v63 }
  0x3e   : > { %757 = vpow2.f32 %v319_v41  ;;  %v293_v29 = vsub.f32 %v943_v26, %v1004_v19  ;;  %v339_v22 = vmul.f32 1.442695, %v291_v14  ;;  %v294_v36 = vsub.f32 %v946_v27, %v1004_v19 }
  0x3f   : > { %759 = vpow2.f32 %v321_v44  ;;  %v341_v23 = vmul.f32 1.442695, %v292_v24  ;;  %v295_v0 = vsub.f32 %v951_v30, %v1004_v19  ;;  %v296_v3 = vsub.f32 %v954_v31, %v1004_v19 }
  0x40   : > { %761 = vpow2.f32 %v323_v45  ;;  %v343_v26 = vmul.f32 1.442695, %v293_v29  ;;  %v345_v27 = vmul.f32 1.442695, %v294_v36  ;;  %v297_v5 = vsub.f32 %v959_v34, %v1004_v19 }
  0x41   : > { %763 = vpow2.f32 %v325_v8  ;;  %v347_v30 = vmul.f32 1.442695, %v295_v0  ;;  %v298_v45 = vsub.f32 %v962_v35, %v1004_v19  ;;  %v349_v31 = vmul.f32 1.442695, %v296_v3 }
  0x42   : > { %v1028_v48 = vpop.eup %745  ;;  %765 = vpow2.f32 %v327_v54  ;;  %v351_v34 = vmul.f32 1.442695, %v297_v5 }
  0x43   : > { %v1030_v7 = vpop.eup %747  ;;  %767 = vpow2.f32 %v329_v57  ;;  %v353_v35 = vmul.f32 1.442695, %v298_v45 }
  0x44   : > { %v1034_v52 = vpop.eup %749  ;;  %v371_v11 = vadd.f32 %v1030_v7, %v1028_v48  ;;  %769 = vpow2.f32 %v331_v16 }
  0x45   : > { %v1038_v53 = vpop.eup %751  ;;  %771 = vpow2.f32 %v333_v17 }
  0x46   : > { %v372_v55 = vadd.f32 %v1034_v52, %v371_v11  ;;  %v1043_v56 = vpop.eup %753  ;;  %773 = vpow2.f32 %v335_v18  ;;  %v299_v11 = vsub.f32 %v967_v38, %v1004_v19 }
  0x47   : > { %v1048_v59 = vpop.eup %755  ;;  %775 = vpow2.f32 %v337_v21 }
  0x48   : > { %v373_v58 = vadd.f32 %v1038_v53, %v372_v55  ;;  %v1053_v62 = vpop.eup %757  ;;  %777 = vpow2.f32 %v339_v22  ;;  %v300_v55 = vsub.f32 %v970_v39, %v1004_v19  ;;  %v355_v38 = vmul.f32 1.442695, %v299_v11 }
  0x49   : > { %v1058_v10 = vpop.eup %759  ;;  %779 = vpow2.f32 %v341_v23 }
  0x4a   : > { %v374_v61 = vadd.f32 %v1043_v56, %v373_v58  ;;  %v1063_v20 = vpop.eup %761  ;;  %781 = vpow2.f32 %v343_v26  ;;  %v301_v58 = vsub.f32 %v975_v42, %v1004_v19  ;;  %v357_v39 = vmul.f32 1.442695, %v300_v55 }
  0x4b   : > { %v1068_v28 = vpop.eup %763  ;;  %783 = vpow2.f32 %v345_v27 }
  0x4c   : > { %v375_v9 = vadd.f32 %v1048_v59, %v374_v61  ;;  %v1073_v33 = vpop.eup %765  ;;  %785 = vpow2.f32 %v347_v30  ;;  %v302_v61 = vsub.f32 %v978_v43, %v1004_v19  ;;  %v359_v42 = vmul.f32 1.442695, %v301_v58 }
  0x4d   : > { %v1078_v40 = vpop.eup %767  ;;  %787 = vpow2.f32 %v349_v31 }
  0x4e   : > { %v376_v15 = vadd.f32 %v1053_v62, %v375_v9  ;;  %v1083_v2 = vpop.eup %769  ;;  %789 = vpow2.f32 %v351_v34  ;;  %v303_v9 = vsub.f32 %v983_v46, %v1004_v19  ;;  %v361_v43 = vmul.f32 1.442695, %v302_v61 }
  0x4f   : > { %v1088_v41 = vpop.eup %771  ;;  %791 = vpow2.f32 %v353_v35 }
  0x50   : > { %v377_v25 = vadd.f32 %v1058_v10, %v376_v15  ;;  %v1093_v6 = vpop.eup %773  ;;  %793 = vpow2.f32 %v355_v38  ;;  %v304_v15 = vsub.f32 %v986_v47, %v1004_v19  ;;  %v363_v46 = vmul.f32 1.442695, %v303_v9  ;;  %v1179_v9 = vld [vmem:[%s1170_s19 + $0x8] sm:$0xff] }
  0x51   : > { %1572 = vst [vmem:[#allocation2_spill] sm:$0xff] %v1093_v6  ;;  %v1098_v8 = vpop.eup %775  ;;  %795 = vpow2.f32 %v357_v39  ;;  %v1173_v39 = vld [vmem:[%s1170_s19] sm:$0xff] }
  0x52   : > { %v378_v32 = vadd.f32 %v1063_v20, %v377_v25  ;;  %1573 = vst [vmem:[#allocation3_spill] sm:$0xff] %v1098_v8  ;;  %v1103_v54 = vpop.eup %777  ;;  %v305_v25 = vsub.f32 %v991_v50, %v1004_v19  ;;  %797 = vpow2.f32 %v359_v42  ;;  %v365_v47 = vmul.f32 1.442695, %v304_v15  ;;  %v1182_v42 = vld [vmem:[%s1170_s19 + $0x88] sm:$0xff]  ;;  %v1188_v15 = vld [vmem:[%s1170_s19 + $0x90] sm:$0xff] }
  0x53   : > { %1574 = vst [vmem:[#allocation4_spill] sm:$0xff] %v1103_v54  ;;  %v1108_v57 = vpop.eup %779  ;;  %799 = vpow2.f32 %v361_v43  ;;  %v1191_v43 = vld [vmem:[%s1170_s19 + $0x18] sm:$0xff] }
  0x54   : > { %v379_v37 = vadd.f32 %v1068_v28, %v378_v32  ;;  %1575 = vst [vmem:[#allocation5_spill] sm:$0xff] %v1108_v57  ;;  %v1113_v16 = vpop.eup %781  ;;  %v306_v32 = vsub.f32 %v994_v51, %v1004_v19  ;;  %801 = vpow2.f32 %v363_v46  ;;  %v1200_v46 = vld [vmem:[%s1170_s19 + $0xa0] sm:$0xff] }
  0x55   : > { %1576 = vst [vmem:[#allocation6_spill] sm:$0xff] %v1113_v16  ;;  %v1118_v17 = vpop.eup %783  ;;  %803 = vpow2.f32 %v365_v47  ;;  %v1209_v47 = vld [vmem:[%s1170_s19 + $0x30] sm:$0xff] }
  0x56   : > { %v380_v1 = vadd.f32 %v1073_v33, %v379_v37  ;;  %1577 = vst [vmem:[#allocation7_spill] sm:$0xff] %v1118_v17  ;;  %v1123_v18 = vpop.eup %785  ;;  %v367_v37 = vmul.f32 1.442695, %v305_v25  ;;  %v369_v26 = vmul.f32 1.442695, %v306_v32  ;;  %v1197_v25 = vld [vmem:[%s1170_s19 + $0x20] sm:$0xff] }
  0x57   : > { %1578 = vst [vmem:[#allocation8_spill] sm:$0xff] %v1123_v18  ;;  %v1128_v21 = vpop.eup %787  ;;  %v1206_v32 = vld [vmem:[%s1170_s19 + $0xa8] sm:$0xff] }
  0x58   : > { %v381_v4 = vadd.f32 %v1078_v40, %v380_v1  ;;  %1579 = vst [vmem:[#allocation9_spill] sm:$0xff] %v1128_v21  ;;  %v1133_v22 = vpop.eup %789  ;;  %805 = vpow2.f32 %v367_v37  ;;  %v1215_v37 = vld [vmem:[%s1170_s19 + $0x38] sm:$0xff] }
  0x59   : > { %1580 = vst [vmem:[#allocation10_spill] sm:$0xff] %v1133_v22  ;;  %v1138_v23 = vpop.eup %791  ;;  %807 = vpow2.f32 %v369_v26  ;;  %1590 = vst [vmem:[#allocation20_spill] sm:$0xff] %v1215_v37  ;;  %v1221_v26 = vld [vmem:[%s1170_s19 + $0x40] sm:$0xff] }
  0x5a   : > { %v382_v44 = vadd.f32 %v1083_v2, %v381_v4  ;;  %1581 = vst [vmem:[#allocation11_spill] sm:$0xff] %v1138_v23  ;;  %v1141_v50 = vpop.eup %793 }
  0x5b   : > { %1582 = vst [vmem:[#allocation12_spill] sm:$0xff] %v1141_v50  ;;  %v1144_v3 = vpop.eup %795 }
  0x5c   : > { %v383_v49 = vadd.f32 %v1088_v41, %v382_v44  ;;  %1583 = vst [vmem:[#allocation13_spill] sm:$0xff] %v1144_v3  ;;  %v1147_v19 = vpop.eup %797 }
  0x5d   : > { %1584 = vst [vmem:[#allocation14_spill] sm:$0xff] %v1147_v19  ;;  %v1150_v4 = vpop.eup %799 }
  0x5e   : > { %v384_v12 = vadd.f32 %v1093_v6, %v383_v49  ;;  %1585 = vst [vmem:[#allocation15_spill] sm:$0xff] %v1150_v4  ;;  %v1153_v30 = vpop.eup %801 }
  0x5f   : > { %1586 = vst [vmem:[#allocation16_spill] sm:$0xff] %v1153_v30  ;;  %v1156_v45 = vpop.eup %803 }
  0x60   : > { %v385_v13 = vadd.f32 %v1098_v8, %v384_v12  ;;  %1587 = vst [vmem:[#allocation17_spill] sm:$0xff] %v1156_v45 }
  0x62   : > { %v386_v60 = vadd.f32 %v1103_v54, %v385_v13  ;;  %v1159_v49 = vpop.eup %805 }
  0x63   : > { %1588 = vst [vmem:[#allocation18_spill] sm:$0xff] %v1159_v49  ;;  %v1162_v34 = vpop.eup %807 }
  0x64   : > { %v387_v63 = vadd.f32 %v1108_v57, %v386_v60  ;;  %1589 = vst [vmem:[#allocation19_spill] sm:$0xff] %v1162_v34 }
  0x66   : > { %v388_v14 = vadd.f32 %v1113_v16, %v387_v63  ;;  %v1176_v63 = vld [vmem:[%s1170_s19 + $0x80] sm:$0xff] }
  0x68   : > { %v389_v24 = vadd.f32 %v1118_v17, %v388_v14  ;;  %v1185_v14 = vld [vmem:[%s1170_s19 + $0x10] sm:$0xff] }
  0x6a   : > { %v390_v29 = vadd.f32 %v1123_v18, %v389_v24  ;;  %v1194_v24 = vld [vmem:[%s1170_s19 + $0x98] sm:$0xff] }
  0x6c   : > { %v391_v36 = vadd.f32 %v1128_v21, %v390_v29  ;;  %v1203_v29 = vld [vmem:[%s1170_s19 + $0x28] sm:$0xff] }
  0x6e   : > { %v392_v0 = vadd.f32 %v1133_v22, %v391_v36  ;;  %v1212_v36 = vld [vmem:[%s1170_s19 + $0xb0] sm:$0xff] }
  0x70   : > { %v393_v1 = vadd.f32 %v1138_v23, %v392_v0  ;;  %v1218_v0 = vld [vmem:[%s1170_s19 + $0xb8] sm:$0xff] }
  0x71   : > { %v483_v22 = vsub.f32 %v1215_v37, %v1218_v0 }
  0x72   : > { %v394_v51 = vadd.f32 %v1141_v50, %v393_v1  ;;  %v1224_v1 = vld [vmem:[%s1170_s19 + $0xc0] sm:$0xff]  ;;  %v1280_v50 = vld [vmem:[%s1170_s19 + $0xf8] sm:$0xff] }
  0x74   : > { %v395_v27 = vadd.f32 %v1144_v3, %v394_v51  ;;  %v1227_v51 = vld [vmem:[%s1170_s19 + $0x48] sm:$0xff]  ;;  %v1277_v3 = vld [vmem:[%s1170_s19 + $0x78] sm:$0xff] }
  0x76   : > { %v396_v5 = vadd.f32 %v1147_v19, %v395_v27  ;;  %v1230_v27 = vld [vmem:[%s1170_s19 + $0xc8] sm:$0xff]  ;;  %v1274_v19 = vld [vmem:[%s1170_s19 + $0xf0] sm:$0xff] }
  0x78   : > { %v397_v44 = vadd.f32 %v1150_v4, %v396_v5  ;;  %v1233_v5 = vld [vmem:[%s1170_s19 + $0x50] sm:$0xff]  ;;  %v482_v4 = vsub.f32 %v1209_v47, %v1212_v36 }
  0x7a   : > { %v398_v31 = vadd.f32 %v1153_v30, %v397_v44  ;;  %v1236_v44 = vld [vmem:[%s1170_s19 + $0xd0] sm:$0xff]  ;;  %v481_v30 = vsub.f32 %v1203_v29, %v1206_v32 }
  0x7c   : > { %v399_v11 = vadd.f32 %v1156_v45, %v398_v31  ;;  %v1239_v31 = vld [vmem:[%s1170_s19 + $0x58] sm:$0xff]  ;;  %v480_v45 = vsub.f32 %v1197_v25, %v1200_v46 }
  0x7e   : > { %v400_v12 = vadd.f32 %v1159_v49, %v399_v11  ;;  %v1242_v11 = vld [vmem:[%s1170_s19 + $0xd8] sm:$0xff]  ;;  %v479_v49 = vsub.f32 %v1191_v43, %v1194_v24 }
  0x80   : > { %v401_v55 = vadd.f32 %v1162_v34, %v400_v12  ;;  %v1245_v12 = vld [vmem:[%s1170_s19 + $0x60] sm:$0xff]  ;;  %v1263_v34 = vld [vmem:[%s1170_s19 + $0x70] sm:$0xff] }
  0x82   : > { %v402_v35 = vrot.slane %v401_v55, 4 }
  0x84   : > { %v403_v13 = vadd.f32 %v402_v35, %v401_v55  ;;  %v1248_v55 = vld [vmem:[%s1170_s19 + $0xe0] sm:$0xff]  ;;  %v476_v35 = vsub.f32 %v1173_v39, %v1176_v63 }
  0x86   : > { %v404_v58 = vrot.slane %v403_v13, 2 }
  0x88   : > { %v405_v38 = vadd.f32 %v404_v58, %v403_v13  ;;  %v477_v13 = vsub.f32 %v1179_v9, %v1182_v42  ;;  %v478_v58 = vsub.f32 %v1185_v14, %v1188_v15 }
  0x8a   : > { %v406_v60 = vrot.slane %v405_v38, 1 }
  0x8c   : > { %v407_v61 = vadd.f32 %v406_v60, %v405_v38  ;;  %v1257_v38 = vld [vmem:[%s1170_s19 + $0x68] sm:$0xff] }
  0x8d   : > { %v1260_v60 = vld [vmem:[%s1170_s19 + $0xe8] sm:$0xff] }
  0x8e   : > { %809 = vrcp.f32 %v407_v61 }
  0x98   : > { %v810_v23 = vpop.eup %809 }
  0x99   : > { %v409_v16 = vmul.f32 %v810_v23, %v407_v61 }
  0x9b   : > { %v410_v17 = vsub.f32 2.0, %v409_v16 }
  0x9d   : > { %v1318_v61 = vmul.f32 %v810_v23, %v410_v17 }
  0x9f   : > { %v444_v54 = vmul.f32 %v1028_v48, %v1318_v61  ;;  %v445_v8 = vmul.f32 %v1030_v7, %v1318_v61  ;;  %v446_v6 = vmul.f32 %v1034_v52, %v1318_v61  ;;  %v447_v21 = vmul.f32 %v1038_v53, %v1318_v61 }
  0xa0   : > { %v448_v18 = vmul.f32 %v1043_v56, %v1318_v61  ;;  %v449_v17 = vmul.f32 %v1048_v59, %v1318_v61  ;;  %v450_v23 = vmul.f32 %v1053_v62, %v1318_v61  ;;  %v451_v48 = vmul.f32 %v1058_v10, %v1318_v61 }
  0xa1   : > { %v492_v16 = vmul.f32 %v476_v35, %v444_v54  ;;  %v493_v7 = vmul.f32 %v477_v13, %v445_v8  ;;  %v494_v57 = vmul.f32 %v478_v58, %v446_v6  ;;  %v495_v37 = vmul.f32 %v479_v49, %v447_v21 }
  0xa2   : > { %v496_v52 = vmul.f32 %v480_v45, %v448_v18  ;;  %v497_v53 = vmul.f32 %v481_v30, %v449_v17  ;;  %v498_v56 = vmul.f32 %v482_v4, %v450_v23  ;;  %v499_v59 = vmul.f32 %v483_v22, %v451_v48 }
  0xa3   : > { %v508_v62 = vadd.f32 %v492_v16, %v1176_v63  ;;  %v509_v10 = vadd.f32 %v493_v7, %v1182_v42  ;;  %v510_v6 = vadd.f32 %v494_v57, %v1188_v15  ;;  %v511_v8 = vadd.f32 %v495_v37, %v1194_v24 }
  0xa4   : > { %v512_v54 = vadd.f32 %v496_v52, %v1200_v46  ;;  %v513_v21 = vadd.f32 %v497_v53, %v1206_v32  ;;  %v514_v18 = vadd.f32 %v498_v56, %v1212_v36  ;;  %v515_v22 = vadd.f32 %v499_v59, %v1218_v0 }
  0xa5   : > { %524 = vst [vmem:[%s1354_s22] sm:$0xff] %v508_v62  ;;  %525 = vst [vmem:[%s1354_s22 + $0x8] sm:$0xff] %v509_v10  ;;  %v452_v4 = vmul.f32 %v1063_v20, %v1318_v61  ;;  %v453_v57 = vmul.f32 %v1068_v28, %v1318_v61  ;;  %v454_v30 = vmul.f32 %v1073_v33, %v1318_v61  ;;  %v1591_v20 = vld [vmem:[#allocation2_spill] sm:$0xff]  ;;  %v1592_v28 = vld [vmem:[#allocation3_spill] sm:$0xff] }
  0xa6   : > { %526 = vst [vmem:[%s1354_s22 + $0x10] sm:$0xff] %v510_v6  ;;  %527 = vst [vmem:[%s1354_s22 + $0x18] sm:$0xff] %v511_v8  ;;  %v455_v45 = vmul.f32 %v1078_v40, %v1318_v61  ;;  %v456_v49 = vmul.f32 %v1083_v2, %v1318_v61  ;;  %v457_v37 = vmul.f32 %v1088_v41, %v1318_v61 }
  0xa7   : > { %528 = vst [vmem:[%s1354_s22 + $0x20] sm:$0xff] %v512_v54  ;;  %529 = vst [vmem:[%s1354_s22 + $0x28] sm:$0xff] %v513_v21  ;;  %v458_v35 = vmul.f32 %v1591_v20, %v1318_v61  ;;  %v459_v13 = vmul.f32 %v1592_v28, %v1318_v61  ;;  %v1593_v33 = vsub.f32 %v1221_v26, %v1224_v1  ;;  %v1603_v20 = vld [vmem:[#allocation6_spill] sm:$0xff]  ;;  %v1604_v28 = vld [vmem:[#allocation7_spill] sm:$0xff] }
  0xa8   : > { %530 = vst [vmem:[%s1354_s22 + $0x30] sm:$0xff] %v514_v18  ;;  %531 = vst [vmem:[%s1354_s22 + $0x38] sm:$0xff] %v515_v22  ;;  %v1594_v58 = vsub.f32 %v1227_v51, %v1230_v27  ;;  %v1595_v2 = vsub.f32 %v1233_v5, %v1236_v44  ;;  %v1596_v17 = vsub.f32 %v1239_v31, %v1242_v11 }
  0xa9   : > { %v500_v40 = vmul.f32 %v1593_v33, %v452_v4  ;;  %v1597_v48 = vsub.f32 %v1245_v12, %v1248_v55  ;;  %v1598_v52 = vsub.f32 %v1257_v38, %v1260_v60  ;;  %v1599_v56 = vsub.f32 %v1263_v34, %v1274_v19  ;;  %v1605_v33 = vld [vmem:[#allocation8_spill] sm:$0xff] }
  0xaa   : > { %v501_v16 = vmul.f32 %v1594_v58, %v453_v57  ;;  %v502_v41 = vmul.f32 %v1595_v2, %v454_v30  ;;  %v503_v23 = vmul.f32 %v1596_v17, %v455_v45  ;;  %v1600_v62 = vsub.f32 %v1277_v3, %v1280_v50  ;;  %v1601_v30 = vld [vmem:[#allocation4_spill] sm:$0xff]  ;;  %v1606_v58 = vld [vmem:[#allocation9_spill] sm:$0xff]  ;;  %v1607_v2 = vld [vmem:[#allocation10_spill] sm:$0xff] }
  0xab   : > { %v504_v7 = vmul.f32 %v1597_v48, %v456_v49  ;;  %v505_v53 = vmul.f32 %v1598_v52, %v457_v37  ;;  %v506_v59 = vmul.f32 %v1599_v56, %v458_v35  ;;  %v516_v6 = vadd.f32 %v500_v40, %v1224_v1  ;;  %v1602_v49 = vld [vmem:[#allocation5_spill] sm:$0xff]  ;;  %v1608_v17 = vld [vmem:[#allocation11_spill] sm:$0xff] }
  0xac   : > { %v507_v10 = vmul.f32 %v1600_v62, %v459_v13  ;;  %v517_v8 = vadd.f32 %v501_v16, %v1230_v27  ;;  %v518_v54 = vadd.f32 %v502_v41, %v1236_v44  ;;  %v519_v21 = vadd.f32 %v503_v23, %v1242_v11 }
  0xad   : > { %v520_v18 = vadd.f32 %v504_v7, %v1248_v55  ;;  %v521_v22 = vadd.f32 %v505_v53, %v1260_v60  ;;  %v522_v4 = vadd.f32 %v506_v59, %v1274_v19  ;;  %532 = vst [vmem:[%s1354_s22 + $0x40] sm:$0xff] %v516_v6  ;;  %v460_v45 = vmul.f32 %v1601_v30, %v1318_v61 }
  0xae   : > { %v523_v57 = vadd.f32 %v507_v10, %v1280_v50  ;;  %533 = vst [vmem:[%s1354_s22 + $0x48] sm:$0xff] %v517_v8  ;;  %534 = vst [vmem:[%s1354_s22 + $0x50] sm:$0xff] %v518_v54  ;;  %v461_v37 = vmul.f32 %v1602_v49, %v1318_v61  ;;  %v462_v35 = vmul.f32 %v1603_v20, %v1318_v61  ;;  %v1623_v20 = vld [vmem:[#allocation17_spill] sm:$0xff] }
  0xaf   : > { %535 = vst [vmem:[%s1354_s22 + $0x58] sm:$0xff] %v519_v21  ;;  %v463_v13 = vmul.f32 %v1604_v28, %v1318_v61  ;;  %536 = vst [vmem:[%s1354_s22 + $0x60] sm:$0xff] %v520_v18  ;;  %v464_v40 = vmul.f32 %v1605_v33, %v1318_v61  ;;  %v465_v16 = vmul.f32 %v1606_v58, %v1318_v61  ;;  %v1616_v21 = vld [vmem:[#allocation20_spill] sm:$0xff]  ;;  %v1624_v28 = vld [vmem:[#allocation18_spill] sm:$0xff] }
  0xb0   : > { %537 = vst [vmem:[%s1354_s22 + $0x68] sm:$0xff] %v521_v22  ;;  %538 = vst [vmem:[%s1354_s22 + $0x70] sm:$0xff] %v522_v4  ;;  %v466_v41 = vmul.f32 %v1607_v2, %v1318_v61  ;;  %v467_v23 = vmul.f32 %v1608_v17, %v1318_v61  ;;  %v1609_v48 = vsub.f32 %v1176_v63, %v1173_v39  ;;  %v1625_v33 = vld [vmem:[#allocation19_spill] sm:$0xff] }
  0xb1   : > { %539 = vst [vmem:[%s1354_s22 + $0x78] sm:$0xff] %v523_v57  ;;  %v1610_v52 = vsub.f32 %v1182_v42, %v1179_v9  ;;  %v1611_v56 = vsub.f32 %v1188_v15, %v1185_v14  ;;  %v1612_v62 = vsub.f32 %v1194_v24, %v1191_v43  ;;  %v1613_v6 = vsub.f32 %v1200_v46, %v1197_v25 }
  0xb2   : > { %v556_v7 = vmul.f32 %v1609_v48, %v460_v45  ;;  %v1614_v42 = vsub.f32 %v1206_v32, %v1203_v29  ;;  %v1615_v54 = vsub.f32 %v1212_v36, %v1209_v47  ;;  %v1617_v18 = vsub.f32 %v1218_v0, %v1616_v21 }
  0xb3   : > { %v557_v53 = vmul.f32 %v1610_v52, %v461_v37  ;;  %v558_v59 = vmul.f32 %v1611_v56, %v462_v35  ;;  %v559_v10 = vmul.f32 %v1612_v62, %v463_v13  ;;  %v560_v63 = vmul.f32 %v1613_v6, %v464_v40 }
  0xb4   : > { %v561_v8 = vmul.f32 %v1614_v42, %v465_v16  ;;  %v562_v15 = vmul.f32 %v1615_v54, %v466_v41  ;;  %v563_v22 = vmul.f32 %v1617_v18, %v467_v23  ;;  %v572_v24 = vadd.f32 %v556_v7, %v1173_v39  ;;  %v1618_v39 = vld [vmem:[#allocation12_spill] sm:$0xff] }
  0xb5   : > { %v573_v4 = vadd.f32 %v557_v53, %v1179_v9  ;;  %v574_v46 = vadd.f32 %v558_v59, %v1185_v14  ;;  %v575_v32 = vadd.f32 %v559_v10, %v1191_v43  ;;  %v576_v57 = vadd.f32 %v560_v63, %v1197_v25  ;;  %v1619_v14 = vld [vmem:[#allocation13_spill] sm:$0xff]  ;;  %v1620_v43 = vld [vmem:[#allocation14_spill] sm:$0xff]  ;;  %v1621_v25 = vld [vmem:[#allocation15_spill] sm:$0xff] }
  0xb6   : > { %v577_v36 = vadd.f32 %v561_v8, %v1203_v29  ;;  %v578_v30 = vadd.f32 %v562_v15, %v1209_v47  ;;  %v579_v0 = vadd.f32 %v563_v22, %v1616_v21  ;;  %588 = vst [vmem:[%s1354_s22 + $0x80] sm:$0xff] %v572_v24  ;;  %v468_v9 = vmul.f32 %v1618_v39, %v1318_v61  ;;  %v1622_v47 = vld [vmem:[#allocation16_spill] sm:$0xff] }
  0xb7   : > { %589 = vst [vmem:[%s1354_s22 + $0x88] sm:$0xff] %v573_v4  ;;  %590 = vst [vmem:[%s1354_s22 + $0x90] sm:$0xff] %v574_v46  ;;  %v469_v45 = vmul.f32 %v1619_v14, %v1318_v61  ;;  %v470_v49 = vmul.f32 %v1620_v43, %v1318_v61  ;;  %v471_v29 = vmul.f32 %v1621_v25, %v1318_v61 }
  0xb8   : > { %591 = vst [vmem:[%s1354_s22 + $0x98] sm:$0xff] %v575_v32  ;;  %592 = vst [vmem:[%s1354_s22 + $0xa0] sm:$0xff] %v576_v57  ;;  %v472_v37 = vmul.f32 %v1622_v47, %v1318_v61  ;;  %v473_v35 = vmul.f32 %v1623_v20, %v1318_v61  ;;  %v474_v13 = vmul.f32 %v1624_v28, %v1318_v61 }
  0xb9   : > { %593 = vst [vmem:[%s1354_s22 + $0xa8] sm:$0xff] %v577_v36  ;;  %594 = vst [vmem:[%s1354_s22 + $0xb0] sm:$0xff] %v578_v30  ;;  %v475_v40 = vmul.f32 %v1625_v33, %v1318_v61  ;;  %v1626_v58 = vsub.f32 %v1224_v1, %v1221_v26  ;;  %v1627_v2 = vsub.f32 %v1230_v27, %v1227_v51 }
  0xba   : > { %595 = vst [vmem:[%s1354_s22 + $0xb8] sm:$0xff] %v579_v0  ;;  %v1628_v17 = vsub.f32 %v1236_v44, %v1233_v5  ;;  %v1629_v48 = vsub.f32 %v1242_v11, %v1239_v31  ;;  %v1630_v61 = vsub.f32 %v1248_v55, %v1245_v12  ;;  %v1631_v27 = vsub.f32 %v1260_v60, %v1257_v38 }
  0xbb   : > { %v564_v16 = vmul.f32 %v1626_v58, %v468_v9  ;;  %v565_v41 = vmul.f32 %v1627_v2, %v469_v45  ;;  %v1632_v44 = vsub.f32 %v1274_v19, %v1263_v34  ;;  %v1633_v11 = vsub.f32 %v1280_v50, %v1277_v3 }
  0xbc   : > { %v566_v23 = vmul.f32 %v1628_v17, %v470_v49  ;;  %v567_v7 = vmul.f32 %v1629_v48, %v471_v29  ;;  %v568_v1 = vmul.f32 %v1630_v61, %v472_v37  ;;  %v569_v52 = vmul.f32 %v1631_v27, %v473_v35 }
  0xbd   : > { %v570_v53 = vmul.f32 %v1632_v44, %v474_v13  ;;  %v571_v56 = vmul.f32 %v1633_v11, %v475_v40  ;;  %v580_v55 = vadd.f32 %v564_v16, %v1221_v26  ;;  %v581_v59 = vadd.f32 %v565_v41, %v1227_v51 }
  0xbe   : > { %v582_v62 = vadd.f32 %v566_v23, %v1233_v5  ;;  %v583_v60 = vadd.f32 %v567_v7, %v1239_v31  ;;  %v584_v10 = vadd.f32 %v568_v1, %v1245_v12  ;;  %v585_v19 = vadd.f32 %v569_v52, %v1257_v38 }
  0xbf   : > { %v586_v6 = vadd.f32 %v570_v53, %v1263_v34  ;;  %v587_v63 = vadd.f32 %v571_v56, %v1277_v3  ;;  %596 = vst [vmem:[%s1354_s22 + $0xc0] sm:$0xff] %v580_v55  ;;  %597 = vst [vmem:[%s1354_s22 + $0xc8] sm:$0xff] %v581_v59 }
  0xc0   : > { %598 = vst [vmem:[%s1354_s22 + $0xd0] sm:$0xff] %v582_v62  ;;  %599 = vst [vmem:[%s1354_s22 + $0xd8] sm:$0xff] %v583_v60 }
  0xc1   : > { %600 = vst [vmem:[%s1354_s22 + $0xe0] sm:$0xff] %v584_v10  ;;  %601 = vst [vmem:[%s1354_s22 + $0xe8] sm:$0xff] %v585_v19 }
  0xc2   : > { %602 = vst [vmem:[%s1354_s22 + $0xf0] sm:$0xff] %v586_v6  ;;  %603 = vst [vmem:[%s1354_s22 + $0xf8] sm:$0xff] %v587_v63 }
  0xc3 PF: > { %s12_s11 = sadd.s32 1, %s833_s11   ;;  %s1634_s9 = smov %s829_s10 }
  0xc4   : > { %p9_p5 = scmp.ge.s32.totalorder %s12_s11, 4   ;;  %s1635_s10 = smov %s1637_s12 }
  0xc6   :  { %11 = sbr.rel (!%p9_p5) target bundleno = 2 (0x2), region = 61 }

</bundles_post_ra>
